<compile_context>
chip_gen: v6e
topology: v6e:2x2x1
jax: 0.10.0
libtpu: 0.0.40
codegen_flags: <defaults>
</compile_context>

<pallas_src>
import functools

import jax
import jax.numpy as jnp
from jax.experimental import pallas as pl
from jax.experimental.pallas import tpu as pltpu

RMS_EPS = 1e-8
SOFTPLUS_THRESHOLD = 20.0
LANE = 128


def _round_up(v, m):
    return ((v + m - 1) // m) * m


@functools.lru_cache(maxsize=1)
def _chip_config():
    """(vmem_capacity_bytes, tensorcores_per_chip) -- trace-time query with fallback."""
    vmem_cap = 128 << 20
    cores = 1
    try:
        vmem_cap = int(pltpu.get_tpu_info().vmem_capacity_bytes)
    except Exception:
        pass
    try:
        kind = jax.devices()[0].device_kind.lower()
        if "v7" in kind or "7x" in kind:       # v7x: 2 TensorCores, 64 MiB VMEM/TC
            cores = 2
            vmem_cap = min(vmem_cap, 64 << 20)
    except Exception:
        pass
    return vmem_cap, cores


def _mish(h):
    """torch Mish (softplus threshold=20 semantics), one EUP exp + one EUP rcp."""
    # tanh(softplus(h)) = (e^2 + 2e) / (e^2 + 2e + 2),  e = exp(min(h, 20))
    e = jnp.exp(jnp.minimum(h, SOFTPLUS_THRESHOLD))
    num = e * (e + 2.0)
    t = jnp.where(h > SOFTPLUS_THRESHOLD, 1.0,
                  num * pl.reciprocal(num + 2.0, approx=True))
    return h * t


# --------------------------------------------------------------------------- #
# Kernels
# --------------------------------------------------------------------------- #
def _heavy_head_kernel(x_ref, w1_ref, b1_ref, w2_ref, b2_ref, o_ref):
    """Fused single-pass path: weights resident in VMEM, 1-D grid over batch."""
    x = x_ref[...].astype(jnp.float32)                               # (bt, F)

    # bn1 (gain folded into w1): x * rsqrt(mean(x^2) + eps)
    inv1 = jax.lax.rsqrt(jnp.mean(x * x, axis=-1, keepdims=True) + RMS_EPS)
    xn = (x * inv1).astype(jnp.bfloat16)

    # fc1 on the MXU: bf16 inputs, f32 accumulation
    h = jnp.dot(xn, w1_ref[...], preferred_element_type=jnp.float32) + b1_ref[...]

    m = _mish(h)                                                     # (bt, H)

    # bn2 (gain folded into w2)
    inv2 = jax.lax.rsqrt(jnp.mean(m * m, axis=-1, keepdims=True) + RMS_EPS)
    mn = (m * inv2).astype(jnp.bfloat16)

    out = jnp.dot(mn, w2_ref[...], preferred_element_type=jnp.float32) + b2_ref[...]
    o_ref[...] = out.astype(o_ref.dtype)


def _heavy_head_ktiled_kernel(x_ref, w1_ref, b1_ref, w2_ref, b2_ref, o_ref,
                              h_acc, ss_acc, *, inv_n_features):
    """K-tiled fallback: stream x / w1 chunks over in_features (grid axis 1)."""
    k = pl.program_id(1)

    @pl.when(k == 0)
    def _():
        h_acc[...] = jnp.zeros_like(h_acc)
        ss_acc[...] = jnp.zeros_like(ss_acc)

    x = x_ref[...].astype(jnp.float32)                               # (bt, tk)
    ss_acc[...] += jnp.sum(x * x, axis=-1, keepdims=True)
    # The per-row rsqrt commutes with the row-space matmul, so accumulate the
    # raw partial product and apply the bn1 scale once on the last K step.
    h_acc[...] += jnp.dot(x.astype(jnp.bfloat16), w1_ref[...],
                          preferred_element_type=jnp.float32)

    @pl.when(k == pl.num_programs(1) - 1)
    def _():
        inv1 = jax.lax.rsqrt(ss_acc[...] * inv_n_features + RMS_EPS)
        h = h_acc[...] * inv1 + b1_ref[...]
        m = _mish(h)
        inv2 = jax.lax.rsqrt(jnp.mean(m * m, axis=-1, keepdims=True) + RMS_EPS)
        mn = (m * inv2).astype(jnp.bfloat16)
        out = jnp.dot(mn, w2_ref[...], preferred_element_type=jnp.float32) + b2_ref[...]
        o_ref[...] = out.astype(o_ref.dtype)


# --------------------------------------------------------------------------- #
# Parameter preparation (one-time, outside the hot path)
# --------------------------------------------------------------------------- #
def prepare_heavy_head_params(params):
    """Transpose Linear weights to (in, out), fold the RMSNorm gains into the
    following Linear weight, cast weights to bf16 (f32 MXU accumulation), and
    lane-pad the final projection to a multiple of 128 for lane-dense stores."""
    H, F = params["w1"].shape              # torch layout: (out, in)
    C = params["w2"].shape[0]
    c_pad = max(LANE, _round_up(C, LANE))

    w1 = (params["w1"].T * params["g1"][:, None]).astype(jnp.bfloat16)    # (F, H)
    w2f = params["w2"].T * params["g2"][:, None]                          # (H, C) f32
    w2 = jnp.zeros((H, c_pad), jnp.bfloat16).at[:, :C].set(w2f.astype(jnp.bfloat16))
    b2 = jnp.zeros((1, c_pad), jnp.float32).at[:, :C].set(
        params["b2"].reshape(1, C).astype(jnp.float32))
    return {
        "w1": w1,                                              # (F, H)   bf16
        "b1": params["b1"].reshape(1, H).astype(jnp.float32),  # (1, H)   f32
        "w2": w2,                                              # (H, Cp)  bf16
        "b2": b2,                                              # (1, Cp)  f32
    }


# --------------------------------------------------------------------------- #
# Wrapper
# --------------------------------------------------------------------------- #
@functools.partial(jax.jit, static_argnames=("block_b", "force_k_tiling"))
def heavy_head(x, prep, *, block_b=1024, force_k_tiling=False):
    """Fused RMSNorm -> Linear -> Mish -> RMSNorm -> Linear.

    Returns lane-padded logits of shape (B, round_up(num_classes, 128));
    slice [:, :num_classes] at the consumer (kept off the kernel hot path so
    all output stores stay lane-dense and no extra HBM round-trip is added).
    """
    B, F = x.shape
    H = prep["w1"].shape[1]
    c_pad = prep["w2"].shape[1]

    vmem_cap, n_cores = _chip_config()
    # ~70% of physical VMEM: ~90 MiB on v5e/v6e (128 MiB), ~45 MiB on v7x (64 MiB).
    vmem_budget = min(96 << 20, int(vmem_cap * 0.7))
    vmem_avail = vmem_budget - (4 << 20)        # headroom for Mosaic internal scratch

    # Resident (single-buffered) constants: bf16 weights + f32 biases.
    const_bytes = F * H * 2 + H * c_pad * 2 + (H + c_pad) * 4

    def fused_bytes(bt_):
        io = 2 * bt_ * F * 4 + 2 * bt_ * c_pad * 4            # double-buffered x / out
        interm = bt_ * (2 * F + 3 * H + c_pad) * 4            # x, xn, h, m, mn, out (f32)
        interm += bt_ * (F + H) * 2                           # bf16 copies fed to MXU
        return io + interm + const_bytes

    def pick_bt(vmem_fn):
        bt_ = min(block_b, B)
        if bt_ < B:
            bt_ = max(8, (bt_ // 8) * 8)
        # v7x megacore only: even number of >=2 grid steps so neither TC idles.
        if n_cores > 1 and B >= 16:
            steps = pl.cdiv(B, bt_)
            if steps % 2 == 1:
                steps = steps + 1 if steps > 1 else 2
            bt_ = min(bt_, max(8, _round_up(pl.cdiv(B, steps), 8)))
        while bt_ > 8 and vmem_fn(bt_) > vmem_avail:
            bt_ = max(8, ((bt_ // 2) // 8) * 8)
        return bt_

    def const_spec(shape):
        # Constant index_map -> single-buffered (halves resident VMEM cost).
        return pl.BlockSpec(shape, lambda i, k=None: (0,) * len(shape),
                            pipeline_mode=pl.Buffered(1))

    cost = pl.CostEstimate(
        flops=2 * B * F * H + 2 * B * H * c_pad,
        transcendentals=2 * B * H,
        bytes_accessed=B * F * 4 + F * H * 2 + H * c_pad * 2 + B * c_pad * 4)

    use_k_tiling = (force_k_tiling or fused_bytes(8) > vmem_avail) and (F % LANE == 0)

    # ----------------------------------------------------------------------- #
    # K-tiled path: stream w1 / x over in_features (large-F / v7x fallback).
    # ----------------------------------------------------------------------- #
    if use_k_tiling:
        cands = [t for t in (1024, 512, 256, 128) if F % t == 0 and t < F] or [F]
        tk = cands[-1] if force_k_tiling else cands[0]

        def ktiled_bytes(bt_):
            io = 2 * (bt_ * tk * 4 + tk * H * 2) + 2 * bt_ * c_pad * 4
            scratch = bt_ * (H + 1) * 4
            interm = bt_ * (tk + 3 * H + c_pad) * 4 + bt_ * (tk + H) * 2
            consts = H * c_pad * 2 + (H + c_pad) * 4
            return io + scratch + interm + consts

        bt = pick_bt(ktiled_bytes)
        grid = (pl.cdiv(B, bt), F // tk)

        return pl.pallas_call(
            functools.partial(_heavy_head_ktiled_kernel, inv_n_features=1.0 / F),
            out_shape=jax.ShapeDtypeStruct((B, c_pad), x.dtype),
            grid_spec=pltpu.PrefetchScalarGridSpec(
                num_scalar_prefetch=0,
                grid=grid,
                in_specs=[
                    pl.BlockSpec((bt, tk), lambda i, k: (i, k)),   # x chunk (streamed)
                    pl.BlockSpec((tk, H), lambda i, k: (k, 0)),    # w1 chunk (streamed)
                    const_spec((1, H)),                            # b1 (resident)
                    const_spec((H, c_pad)),                        # w2 (resident)
                    const_spec((1, c_pad)),                        # b2 (resident)
                ],
                out_specs=pl.BlockSpec((bt, c_pad), lambda i, k: (i, 0)),
                scratch_shapes=[pltpu.VMEM((bt, H), jnp.float32),   # fc1 accumulator
                                pltpu.VMEM((bt, 1), jnp.float32)],  # sum(x^2) accumulator
            ),
            compiler_params=pltpu.CompilerParams(
                dimension_semantics=("parallel", "arbitrary"),
                vmem_limit_bytes=vmem_budget),
            cost_estimate=cost,
        )(x, prep["w1"], prep["b1"], prep["w2"], prep["b2"])

    # ----------------------------------------------------------------------- #
    # Fused single-pass path: weights resident, 1-D grid over batch rows.
    # ----------------------------------------------------------------------- #
    bt = pick_bt(fused_bytes)
    grid = (pl.cdiv(B, bt),)

    return pl.pallas_call(
        _heavy_head_kernel,
        out_shape=jax.ShapeDtypeStruct((B, c_pad), x.dtype),
        grid_spec=pltpu.PrefetchScalarGridSpec(
            num_scalar_prefetch=0,
            grid=grid,
            in_specs=[
                pl.BlockSpec((bt, F), lambda i: (i, 0)),   # x tile (pipelined)
                const_spec((F, H)),                        # w1 (gain-folded, bf16)
                const_spec((1, H)),                        # b1
                const_spec((H, c_pad)),                    # w2 (gain-folded, bf16, padded)
                const_spec((1, c_pad)),                    # b2 (padded)
            ],
            out_specs=pl.BlockSpec((bt, c_pad), lambda i: (i, 0)),
        ),
        compiler_params=pltpu.CompilerParams(
            dimension_semantics=("parallel",),
            vmem_limit_bytes=vmem_budget),
        cost_estimate=cost,
    )(x, prep["w1"], prep["b1"], prep["w2"], prep["b2"])


# --------------------------------------------------------------------------- #
# Init + reference
# --------------------------------------------------------------------------- #
def init_heavy_head_params(key, in_features, num_classes):
    """Deterministic PyTorch-style init (uniform(-1/sqrt(fan_in), 1/sqrt(fan_in)))."""
    hidden = in_features // 2
    k1, k2, k3, k4, k5, k6 = jax.random.split(key, 6)
    lim1 = 1.0 / jnp.sqrt(in_features)
    lim2 = 1.0 / jnp.sqrt(hidden)
    return {
        # RMSNorm weights (ones in torch; perturbed to keep the test non-trivial)
        "g1": 1.0 + 0.01 * jax.random.normal(k5, (in_features,), jnp.float32),
        "g2": 1.0 + 0.01 * jax.random.normal(k6, (hidden,), jnp.float32),
        # Linear layers in torch layout: weight (out, in), bias (out,)
        "w1": jax.random.uniform(k1, (hidden, in_features), jnp.float32, -lim1, lim1),
        "b1": jax.random.uniform(k2, (hidden,), jnp.float32, -lim1, lim1),
        "w2": jax.random.uniform(k3, (num_classes, hidden), jnp.float32, -lim2, lim2),
        "b2": jax.random.uniform(k4, (num_classes,), jnp.float32, -lim2, lim2),
    }


def heavy_head_reference(x, params):
    """Pure-JAX f32 reference mirroring the PyTorch forward (torch Mish semantics)."""
    def rmsnorm(v, g):
        return v * jax.lax.rsqrt(jnp.mean(v * v, axis=-1, keepdims=True) + RMS_EPS) * g

    h = rmsnorm(x, params["g1"]) @ params["w1"].T + params["b1"]
    sp = jnp.where(h > SOFTPLUS_THRESHOLD, h,
                   jnp.log1p(jnp.exp(jnp.minimum(h, SOFTPLUS_THRESHOLD))))
    m = h * jnp.tanh(sp)
    return rmsnorm(m, params["g2"]) @ params["w2"].T + params["b2"]


if __name__ == "__main__":
    key = jax.random.PRNGKey(0)
    k1, k2, k3, k4 = jax.random.split(key, 4)

    # bf16 MXU inputs (f32 accumulation) -> relaxed tolerance vs the f32 reference.
    ATOL = RTOL = 5e-2

    # --- Case 1: small shapes -> fused single-pass path (weights resident) ---
    F1, C1, B1 = 32, 8, 8
    x1 = jax.random.normal(k1, (B1, F1), jnp.float32)
    p1 = init_heavy_head_params(k2, F1, C1)
    prep1 = prepare_heavy_head_params(p1)            # one-time, outside the hot path
    out1 = jax.block_until_ready(heavy_head(x1, prep1))[:, :C1]   # consumer-side slice
    ref1 = heavy_head_reference(x1, p1)
    assert out1.shape == (B1, C1)
    assert jnp.allclose(out1, ref1, atol=ATOL, rtol=RTOL), (
        f"fused path max abs err {jnp.max(jnp.abs(out1 - ref1))}")

    # --- Case 2: force the K-tiled (streamed-weight) fallback path ---
    F2, C2, B2 = 256, 10, 64
    x2 = jax.random.normal(k3, (B2, F2), jnp.float32)
    p2 = init_heavy_head_params(k4, F2, C2)
    prep2 = prepare_heavy_head_params(p2)
    out2 = jax.block_until_ready(heavy_head(x2, prep2, force_k_tiling=True))[:, :C2]
    ref2 = heavy_head_reference(x2, p2)
    assert out2.shape == (B2, C2)
    assert jnp.allclose(out2, ref2, atol=ATOL, rtol=RTOL), (
        f"k-tiled path max abs err {jnp.max(jnp.abs(out2 - ref2))}")

    print("KERNEL_OK")
</pallas_src>

<mosaic_0001>
module attributes {stable_mosaic.version = 11 : i64} {
  func.func @_heavy_head_kernel(%arg0: i32, %arg1: memref<8x32xf32, #tpu.memory_space<vmem>>, %arg2: memref<32x16xbf16, #tpu.memory_space<vmem>>, %arg3: memref<1x16xf32, #tpu.memory_space<vmem>>, %arg4: memref<16x128xbf16, #tpu.memory_space<vmem>>, %arg5: memref<1x128xf32, #tpu.memory_space<vmem>>, %arg6: memref<8x128xf32, #tpu.memory_space<vmem>>) attributes {dimension_semantics = [#tpu.dimension_semantics<parallel>], iteration_bounds = array<i64: 1>, scalar_prefetch = 0 : i64, scratch_operands = 0 : i64, tpu.core_type = #tpu.core_type<tc>, window_params = [{transform_indices = @transform_0, window_bounds = array<i64: 8, 32>}, {pipeline_mode = #tpu.pipeline_mode<synchronous>, transform_indices = @transform_1, window_bounds = array<i64: 32, 16>}, {pipeline_mode = #tpu.pipeline_mode<synchronous>, transform_indices = @transform_2, window_bounds = array<i64: 1, 16>}, {pipeline_mode = #tpu.pipeline_mode<synchronous>, transform_indices = @transform_3, window_bounds = array<i64: 16, 128>}, {pipeline_mode = #tpu.pipeline_mode<synchronous>, transform_indices = @transform_4, window_bounds = array<i64: 1, 128>}, {transform_indices = @transform_5, window_bounds = array<i64: 8, 128>}]} {
    %c0 = arith.constant 0 : index
    %c0_0 = arith.constant 0 : index
    %0 = vector.load %arg1[%c0, %c0_0] : memref<8x32xf32, #tpu.memory_space<vmem>>, vector<8x32xf32>
    %1 = arith.mulf %0, %0 : vector<8x32xf32>
    %cst = arith.constant dense<0.000000e+00> : vector<8xf32>
    %2 = vector.multi_reduction <add>, %1, %cst [1] : vector<8x32xf32> to vector<8xf32>
    %3 = vector.shape_cast %2 : vector<8xf32> to vector<8x1xf32>
    %cst_1 = arith.constant 3.200000e+01 : f32
    %4 = vector.broadcast %cst_1 : f32 to vector<8x1xf32>
    %5 = arith.divf %3, %4 : vector<8x1xf32>
    %cst_2 = arith.constant 9.99999993E-9 : f32
    %6 = vector.broadcast %cst_2 : f32 to vector<8x1xf32>
    %7 = arith.addf %5, %6 : vector<8x1xf32>
    %8 = math.rsqrt %7 : vector<8x1xf32>
    %9 = vector.broadcast %8 : vector<8x1xf32> to vector<8x32xf32>
    %10 = arith.mulf %0, %9 : vector<8x32xf32>
    %11 = arith.truncf %10 : vector<8x32xf32> to vector<8x32xbf16>
    %c0_3 = arith.constant 0 : index
    %c0_4 = arith.constant 0 : index
    %12 = vector.load %arg2[%c0_3, %c0_4] : memref<32x16xbf16, #tpu.memory_space<vmem>>, vector<32x16xbf16>
    %cst_5 = arith.constant dense<0.000000e+00> : vector<8x16xf32>
    %13 = tpu.matmul %11, %12, %cst_5 {dimension_numbers = #tpu.dot_dimension_numbers<[1], [0], [0], [1], [0, 0, 1, 1], [], []>} : vector<8x32xbf16>, vector<32x16xbf16>, vector<8x16xf32> -> vector<8x16xf32>
    %c0_6 = arith.constant 0 : index
    %c0_7 = arith.constant 0 : index
    %14 = vector.load %arg3[%c0_6, %c0_7] : memref<1x16xf32, #tpu.memory_space<vmem>>, vector<1x16xf32>
    %15 = vector.broadcast %14 : vector<1x16xf32> to vector<8x16xf32>
    %16 = arith.addf %13, %15 : vector<8x16xf32>
    %cst_8 = arith.constant 2.000000e+01 : f32
    %17 = vector.broadcast %cst_8 : f32 to vector<8x16xf32>
    %18 = arith.minimumf %16, %17 : vector<8x16xf32>
    %19 = math.exp %18 : vector<8x16xf32>
    %cst_9 = arith.constant 2.000000e+00 : f32
    %20 = vector.broadcast %cst_9 : f32 to vector<8x16xf32>
    %21 = arith.addf %19, %20 : vector<8x16xf32>
    %22 = arith.mulf %19, %21 : vector<8x16xf32>
    %cst_10 = arith.constant 2.000000e+01 : f32
    %23 = vector.broadcast %cst_10 : f32 to vector<8x16xf32>
    %24 = arith.cmpf ogt, %16, %23 : vector<8x16xf32>
    %cst_11 = arith.constant 2.000000e+00 : f32
    %25 = vector.broadcast %cst_11 : f32 to vector<8x16xf32>
    %26 = arith.addf %22, %25 : vector<8x16xf32>
    %27 = tpu.reciprocal %26 {approx = true} : vector<8x16xf32> -> vector<8x16xf32>
    %28 = arith.mulf %22, %27 : vector<8x16xf32>
    %cst_12 = arith.constant 1.000000e+00 : f32
    %29 = vector.broadcast %cst_12 : f32 to vector<8x16xf32>
    %30 = arith.select %24, %29, %28 : vector<8x16xi1>, vector<8x16xf32>
    %31 = arith.mulf %16, %30 : vector<8x16xf32>
    %32 = arith.mulf %31, %31 : vector<8x16xf32>
    %cst_13 = arith.constant dense<0.000000e+00> : vector<8xf32>
    %33 = vector.multi_reduction <add>, %32, %cst_13 [1] : vector<8x16xf32> to vector<8xf32>
    %34 = vector.shape_cast %33 : vector<8xf32> to vector<8x1xf32>
    %cst_14 = arith.constant 1.600000e+01 : f32
    %35 = vector.broadcast %cst_14 : f32 to vector<8x1xf32>
    %36 = arith.divf %34, %35 : vector<8x1xf32>
    %cst_15 = arith.constant 9.99999993E-9 : f32
    %37 = vector.broadcast %cst_15 : f32 to vector<8x1xf32>
    %38 = arith.addf %36, %37 : vector<8x1xf32>
    %39 = math.rsqrt %38 : vector<8x1xf32>
    %40 = vector.broadcast %39 : vector<8x1xf32> to vector<8x16xf32>
    %41 = arith.mulf %31, %40 : vector<8x16xf32>
    %42 = arith.truncf %41 : vector<8x16xf32> to vector<8x16xbf16>
    %c0_16 = arith.constant 0 : index
    %c0_17 = arith.constant 0 : index
    %43 = vector.load %arg4[%c0_16, %c0_17] : memref<16x128xbf16, #tpu.memory_space<vmem>>, vector<16x128xbf16>
    %cst_18 = arith.constant dense<0.000000e+00> : vector<8x128xf32>
    %44 = tpu.matmul %42, %43, %cst_18 {dimension_numbers = #tpu.dot_dimension_numbers<[1], [0], [0], [1], [0, 0, 1, 1], [], []>} : vector<8x16xbf16>, vector<16x128xbf16>, vector<8x128xf32> -> vector<8x128xf32>
    %c0_19 = arith.constant 0 : index
    %c0_20 = arith.constant 0 : index
    %45 = vector.load %arg5[%c0_19, %c0_20] : memref<1x128xf32, #tpu.memory_space<vmem>>, vector<1x128xf32>
    %46 = vector.broadcast %45 : vector<1x128xf32> to vector<8x128xf32>
    %47 = arith.addf %44, %46 : vector<8x128xf32>
    %c0_21 = arith.constant 0 : index
    %c0_22 = arith.constant 0 : index
    %48 = vector.load %arg6[%c0_21, %c0_22] : memref<8x128xf32, #tpu.memory_space<vmem>>, vector<8x128xf32>
    tpu.vector_store %arg6[%c0_21, %c0_22], %47 {strides = array<i32>} : memref<8x128xf32, #tpu.memory_space<vmem>>, vector<8x128xf32>,
    return
  }
  func.func @transform_0(%arg0: i32) -> (i32, i32) {
    %c0_i32 = arith.constant 0 : i32
    %c0_i32_0 = arith.constant 0 : i32
    return %arg0, %c0_i32 : i32, i32
  }
  func.func @transform_1(%arg0: i32) -> (i32, i32) {
    %c0_i32 = arith.constant 0 : i32
    %c0_i32_0 = arith.constant 0 : i32
    %c0_i32_1 = arith.constant 0 : i32
    return %c0_i32, %c0_i32_0 : i32, i32
  }
  func.func @transform_2(%arg0: i32) -> (i32, i32) {
    %c0_i32 = arith.constant 0 : i32
    %c0_i32_0 = arith.constant 0 : i32
    %c0_i32_1 = arith.constant 0 : i32
    return %c0_i32, %c0_i32_0 : i32, i32
  }
  func.func @transform_3(%arg0: i32) -> (i32, i32) {
    %c0_i32 = arith.constant 0 : i32
    %c0_i32_0 = arith.constant 0 : i32
    %c0_i32_1 = arith.constant 0 : i32
    return %c0_i32, %c0_i32_0 : i32, i32
  }
  func.func @transform_4(%arg0: i32) -> (i32, i32) {
    %c0_i32 = arith.constant 0 : i32
    %c0_i32_0 = arith.constant 0 : i32
    %c0_i32_1 = arith.constant 0 : i32
    return %c0_i32, %c0_i32_0 : i32, i32
  }
  func.func @transform_5(%arg0: i32) -> (i32, i32) {
    %c0_i32 = arith.constant 0 : i32
    %c0_i32_0 = arith.constant 0 : i32
    return %arg0, %c0_i32 : i32, i32
  }
}

</mosaic_0001>

<bundles_post_ra>
// kernel: heavy_head.1
= control target key start
LH: loop header
LB: loop body
LE: loop exit
PB: predicated region body
PF: predicated region fallthrough
CT: control target
= control target key end

     0   :  { %vm24_vm0 = vcmask 261120   ;;  %s313_s0 = inlined_call_operand.vmem [shape: f32[8,32], index: 0, kind: input, shape index: {}]   ;;  %s314_s1 = inlined_call_operand.vmem [shape: bf16[32,16], index: 1, kind: input, shape index: {}]   ;;  %s315_s2 = inlined_call_operand.vmem [shape: f32[1,16], index: 2, kind: input, shape index: {}]   ;;  %s316_s3 = inlined_call_operand.vmem [shape: bf16[16,128], index: 3, kind: input, shape index: {}]   ;;  %s317_s4 = inlined_call_operand.vmem [shape: f32[1,128], index: 4, kind: input, shape index: {}]   ;;  %s318_s5 = inlined_call_operand.hbm [shape: f32[8,128], index: 5, kind: output, shape index: {}]  }
   0x1   :  { %v22_v0 = vld [vmem:[%s313_s0] sm:$0xff] }
   0x2   :  { %v23_v1 = vmul.f32 %v22_v0, %v22_v0 }
   0x3   :  { %10 = vsyncpa [#allocation3], 0  ;;  %v224_v3 = vld [vmem:[%s314_s1 + $0x8] sm:$0xff]   ;;  %v257_v4 = vmov 0.0   ;;  %vm258_vm1 = vmmov 0   ;;  %v225_v5 = vld [vmem:[%s314_s1] sm:$0xff]  }
   0x4   :  { %v25_v2 = vsel %vm24_vm0, %v23_v1, 0.0  ;;  %207 = vmatprep.subr.bf16.mxu0 %v257_v4  ;;  %211 = vmatprep.mubr.msk.bf16.mxu0 %vm258_vm1, %v257_v4  ;;  %v195_v12 = vld [vmem:[%s315_s2] ss:$0 sm:$0xff]  ;;  %vm112_vm3 = vcmask 130048   ;;  %s259_s27 = smov [#allocation2]  }
   0x5   :  { %26 = vadd.xlane.f32.xlu0 %v25_v2  ;;  %208 = vmatpush3.bf16.msra.mxu0 %v224_v3  ;;  %v226_v30 = vld [vmem:[%s316_s3] sm:$0xff]   ;;  %s187_s28 = sshll.u32 %s259_s27, 4  ;;  %s188_s28 = int_to_ptr.vmem [resolvable:$true] %s187_s28 }
   0x6   :  { %215 = vmatprep.subr.bf16.mxu1 %v257_v4  ;;  %209 = vmatprep.subr.bf16.mxu0 %v257_v4  ;;  %v199_v37 = vld [vmem:[%s317_s4] ss:$0 sm:$0xff]  ;;  %s235_s3 = scalar_lea.vmem %s188_s28, 128  ;;  %p240_p1 = scmp.lt.s32.totalorder %s188_s28, %s188_s28 }
   0x7   :  { %217 = vmatprep.mubr.msk.bf16.mxu1 %vm258_vm1, %v257_v4  ;;  %216 = vmatpush3.bf16.msra.mxu1 %v226_v30  ;;  %p236_p0 = scmp.ne.s32.totalorder %s188_s28, %s235_s3  ;;  %p241_p2 = scmp.lt.s32.totalorder %s235_s3, %s235_s3 }
   0x9   :  { %210 = vmatpush3.bf16.msra.mxu0 %v225_v5  ;;  %p242_p3 = por %p241_p2, %p240_p1 }
   0xb   :  { %p243_p4 = pnand %p242_p3, %p236_p0 }
  0x8e   :  { %v27_v6 = vpop.xlane.xlu0 %26 }
  0x8f   :  { %v29_v7 = vmul.f32 0.03125, %v27_v6 }
  0x91   :  { %v30_v8 = vadd.f32 1e-08, %v29_v7 }
  0x93   :  { %227 = vrsqrt.f32 %v30_v8 }
  0xa0   :  { %v228_v9 = vpop.eup %227 }
  0xa1   :  { %v32_v10 = vmul.f32 %v228_v9, %v22_v0 }
  0xa3   :  { %v33_v11 = vpack.c.bf16 %v32_v10, %v32_v10 }
  0xa5   :  { %212 = vmatmul.mubr.msk.bf16.vlgmr.msra.gmra.mxu0 %vm24_vm0, %v33_v11 }
 0x165   :  { %v94_v13 = vpop.f32.mrf.mxu0 }
 0x166   :  { %v95_v14 = vadd.f32 %v195_v12, %v94_v13 }
 0x167   :  { %v213_v15 = vpop.f32.mrf.mxu0 }
 0x168   :  { %v100_v16 = vmin.f32 %v95_v14, 20.0  ;;  %vm105_vm2 = vcmp.gt.f32.partialorder %v95_v14, 20.0 }
 0x169   :  { %v97_v17 = vpop.f32.mrf.mxu0 }
 0x16a   :  { %v101_v18 = vmul.f32 1.442695, %v100_v16 }
 0x16b   :  { %v214_v19 = vpop.f32.mrf.mxu0 }
 0x16c   :  { %229 = vpow2.f32 %v101_v18 }
 0x179   :  { %v230_v20 = vpop.eup %229 }
 0x17a   :  { %v103_v21 = vadd.f32 2.0, %v230_v20 }
 0x17c   :  { %v104_v22 = vmul.f32 %v230_v20, %v103_v21 }
 0x17e   :  { %v106_v23 = vadd.f32 2.0, %v104_v22 }
 0x180   :  { %231 = vrcp.f32 %v106_v23 }
 0x18d   :  { %v232_v24 = vpop.eup %231 }
 0x18e   :  { %v108_v25 = vmul.f32 %v232_v24, %v104_v22 }
 0x190   :  { %v109_v26 = vsel %vm105_vm2, 1.0, %v108_v25 }
 0x191   :  { %v110_v27 = vmul.f32 %v109_v26, %v95_v14 }
 0x193   :  { %v111_v28 = vmul.f32 %v110_v27, %v110_v27 }
 0x195   :  { %v113_v29 = vsel %vm112_vm3, %v111_v28, 0.0 }
 0x196   :  { %114 = vadd.xlane.f32.xlu0 %v113_v29 }
 0x21f   :  { %v115_v31 = vpop.xlane.xlu0 %114 }
 0x220   :  { %v117_v32 = vmul.f32 0.0625, %v115_v31 }
 0x222   :  { %v118_v33 = vadd.f32 1e-08, %v117_v32 }
 0x224   :  { %233 = vrsqrt.f32 %v118_v33 }
 0x231   :  { %v234_v34 = vpop.eup %233 }
 0x232   :  { %v120_v35 = vmul.f32 %v234_v34, %v110_v27 }
 0x234   :  { %v121_v36 = vpack.c.bf16 %v120_v35, %v120_v35 }
 0x236   :  { %218 = vmatmul.mubr.msk.bf16.vlgmr.msra.gmra.mxu1 %vm112_vm3, %v121_v36 }
 0x2f6   :  { %v174_v38 = vpop.f32.mrf.mxu1 }
 0x2f7   :  { %v175_v39 = vadd.f32 %v199_v37, %v174_v38 }
 0x2f8   :  { %v219_v40 = vpop.f32.mrf.mxu1 }
 0x2f9   :  { %180 = vst [vmem:[#allocation2] sm:$0xff] %v175_v39 }
 0x2fa   :  { %v177_v41 = vpop.f32.mrf.mxu1 }
 0x2fb   :  { %246 = shalt.err (!%p243_p4)
}
 0x2fc   :  { %190 = dma.vmem_to_hbm [thread:$0]  %s188_s28, 128, %s318_s5, [#allocation3]   ;;  %v220_v42 = vpop.f32.mrf.mxu1 }
 0x2fd   :  { %255 = dma.done.wait [#allocation3], 128  }
 0x2fe   :  { %256 = vsyncadd [#allocation3], 4294967168 }
 0x2ff   :  { %194 = vsyncpa [#allocation3], 1 }

</bundles_post_ra>
